<compile_context>
chip_gen: v7x
topology: tpu7x:2x2x1
jax: 0.10.0
libtpu: 0.0.40
codegen_flags: <defaults>
</compile_context>

<pallas_src>
import functools

import jax
import jax.numpy as jnp
from jax.experimental import pallas as pl
from jax.experimental.pallas import tpu as pltpu


def _round_up(a: int, m: int) -> int:
    return -(-a // m) * m


def _linear_kernel(x_ref, w_ref, b_ref, o_ref, acc_ref):
    """One (i, j) output tile, accumulated over the k (reduction) grid axis."""
    k = pl.program_id(2)

    @pl.when(k == 0)
    def _():
        # Bias-initialized accumulator (saves a full-tile add in the epilogue).
        acc_ref[...] = jnp.broadcast_to(b_ref[...], acc_ref.shape)

    acc_ref[...] += jnp.dot(
        x_ref[...], w_ref[...], preferred_element_type=jnp.float32
    )

    @pl.when(k == pl.num_programs(2) - 1)
    def _():
        # Single cast, lane-dense full-width store.
        o_ref[...] = acc_ref[...].astype(o_ref.dtype)


@functools.partial(
    jax.jit, static_argnames=("d_out", "compute_dtype", "out_dtype")
)
def _linear_apply(x, w_p, b_p, *, d_out, compute_dtype, out_dtype):
    """x: (B, D_in); w_p: (Kp, Np) padded W^T; b_p: (1, Np) padded bias (f32)."""
    B, D_in = x.shape
    Kp, Np = w_p.shape
    cdt = jnp.dtype(compute_dtype)
    odt = jnp.dtype(out_dtype)

    # ---- tile selection (static, derived from shapes) ----------------------
    sublane = 16 if cdt == jnp.dtype(jnp.bfloat16) else 8
    tm = min(256, _round_up(B, sublane))
    Mp = _round_up(B, tm)

    tk = Kp if Kp <= 512 else 512            # prepare() guarantees 512 | Kp then
    k_steps = Kp // tk

    tn = 256 if (Np >= 256 and Np % 256 == 0) else 128
    # v7x megacore: if the batch axis has a single tile, make sure the D_out
    # axis has >= 2 blocks so both TensorCores get work.
    if Mp // tm == 1 and Np // tn < 2 and Np >= 256:
        tn = 128

    grid = (Mp // tm, Np // tn, k_steps)

    # ---- per-call x padding only when actually needed -----------------------
    x_c = x.astype(cdt)
    if (Mp != B) or (Kp != D_in):
        x_p = jnp.zeros((Mp, Kp), cdt).at[:B, :D_in].set(x_c)
    else:
        x_p = x_c

    # ---- weight pipeline depth: skinny-M / DMA-bound shapes get 3 buffers ---
    if k_steps >= 3 and tm <= 128:
        w_spec = pl.BlockSpec(
            (tk, tn), lambda i, j, k: (k, j), pipeline_mode=pl.Buffered(3)
        )
        w_bufs = 3
    else:
        w_spec = pl.BlockSpec((tk, tn), lambda i, j, k: (k, j))
        w_bufs = 2

    # ---- VMEM budget (fits v7x's 64 MiB physical; generous on v5e/v6e) ------
    cbytes = cdt.itemsize
    obytes = odt.itemsize
    vmem_bytes = (
        2 * tm * tk * cbytes          # x tiles, double-buffered
        + w_bufs * tk * tn * cbytes   # weight tiles
        + 2 * tn * 4                  # bias tile
        + tm * tn * 4                 # f32 accumulator
        + 2 * tm * tn * obytes        # output tiles, double-buffered
    )
    vmem_limit = int(min(64 * 1024 * 1024, max(2 * vmem_bytes, 16 * 1024 * 1024)))

    cost = pl.CostEstimate(
        flops=2 * Mp * Np * Kp,
        transcendentals=0,
        bytes_accessed=(
            Mp * Kp * cbytes + Kp * Np * cbytes + Np * 4 + Mp * Np * obytes
        ),
    )

    out_p = pl.pallas_call(
        _linear_kernel,
        out_shape=jax.ShapeDtypeStruct((Mp, Np), odt),
        grid_spec=pltpu.PrefetchScalarGridSpec(
            num_scalar_prefetch=0,
            grid=grid,
            in_specs=[
                pl.BlockSpec((tm, tk), lambda i, j, k: (i, k)),   # x tile
                w_spec,                                           # W^T tile
                pl.BlockSpec((1, tn), lambda i, j, k: (0, j)),    # bias (k-resident)
            ],
            out_specs=pl.BlockSpec((tm, tn), lambda i, j, k: (i, j)),
            scratch_shapes=[pltpu.VMEM((tm, tn), jnp.float32)],   # f32 accumulator
        ),
        compiler_params=pltpu.CompilerParams(
            dimension_semantics=("parallel", "parallel", "arbitrary"),
            vmem_limit_bytes=vmem_limit,
        ),
        cost_estimate=cost,
    )(x_p, w_p, b_p)

    if (Mp != B) or (Np != d_out):
        return out_p[:B, :d_out]
    return out_p


class PallasLinear:
    """JAX/Pallas equivalent of nn.Linear(args['input_shape'], args['num_class']).

    Padding / transpose of the (static) parameters is done ONCE here, not per
    forward call.
    """

    def __init__(self, weight, bias, *, compute_dtype=jnp.float32, out_dtype=None):
        # weight: (D_out, D_in) in PyTorch nn.Linear layout; bias: (D_out,)
        self.d_out, self.d_in = int(weight.shape[0]), int(weight.shape[1])
        self.compute_dtype = jnp.dtype(compute_dtype)
        self.out_dtype = jnp.dtype(out_dtype) if out_dtype is not None else None

        # Padded-layout choices shared with the per-call tiling logic.
        Np = _round_up(self.d_out, 128)                    # lane-dense output axis
        Kp = (_round_up(self.d_in, 8) if self.d_in <= 512
              else _round_up(self.d_in, 512))              # reduction axis

        w_t = weight.T.astype(self.compute_dtype)          # (D_in, D_out)
        self.w_p = (jnp.zeros((Kp, Np), self.compute_dtype)
                    .at[: self.d_in, : self.d_out].set(w_t))
        self.b_p = (jnp.zeros((1, Np), jnp.float32)
                    .at[0, : self.d_out].set(bias.astype(jnp.float32)))

        # Keep originals for the tiny-shape XLA fallback path.
        self._weight = weight
        self._bias = bias

    def __call__(self, x, *, force_pallas=False):
        out_dtype = self.out_dtype if self.out_dtype is not None else x.dtype
        B = int(x.shape[0])
        # At tiny sizes the custom call is pure launch/DMA overhead: fall back
        # to a single fused XLA op unless the caller forces the Pallas path.
        if not force_pallas and (2 * B * self.d_in * self.d_out) < (1 << 18):
            return (x @ self._weight.T + self._bias).astype(out_dtype)
        return _linear_apply(
            x, self.w_p, self.b_p,
            d_out=self.d_out,
            compute_dtype=self.compute_dtype.type,
            out_dtype=out_dtype.type if hasattr(out_dtype, "type") else out_dtype,
        )


if __name__ == "__main__":
    # Shapes consistent with the module: args['input_shape']=32, num_class=16
    B, D_in, D_out = 8, 32, 16

    key = jax.random.PRNGKey(0)
    kx, kw, kb = jax.random.split(key, 3)

    # Deterministic init mimicking nn.Linear uniform(-1/sqrt(in), 1/sqrt(in))
    bound = 1.0 / (D_in ** 0.5)
    weight = jax.random.uniform(kw, (D_out, D_in), jnp.float32, -bound, bound)
    bias = jax.random.uniform(kb, (D_out,), jnp.float32, -bound, bound)
    x = jax.random.normal(kx, (B, D_in), jnp.float32)

    # For realistic sizes on v6e/v7x, build with compute_dtype=jnp.bfloat16
    # (f32 accumulation is kept inside the kernel).  Tiny demo stays f32 so the
    # reference comparison can be exact.
    model = PallasLinear(weight, bias, compute_dtype=jnp.float32)

    # force_pallas=True so the demo actually exercises the kernel (the default
    # dispatch would route this tiny shape to plain XLA).
    out = model(x, force_pallas=True)
    out = jax.block_until_ready(out)

    # Sanity check against plain JAX reference.
    ref = x @ weight.T + bias
    assert out.shape == (B, D_out)
    assert jnp.allclose(out, ref, atol=1e-5, rtol=1e-5)

    print("KERNEL_OK")
</pallas_src>

<mosaic_0001>
module attributes {stable_mosaic.version = 11 : i64} {
  func.func @_linear_kernel(%arg0: i32, %arg1: i32, %arg2: i32, %arg3: memref<8x32xf32, #tpu.memory_space<vmem>>, %arg4: memref<32x128xf32, #tpu.memory_space<vmem>>, %arg5: memref<1x128xf32, #tpu.memory_space<vmem>>, %arg6: memref<8x128xf32, #tpu.memory_space<vmem>>, %arg7: memref<8x128xf32, #tpu.memory_space<vmem>>) attributes {dimension_semantics = [#tpu.dimension_semantics<parallel>, #tpu.dimension_semantics<parallel>, #tpu.dimension_semantics<arbitrary>], iteration_bounds = array<i64: 1, 1, 1>, scalar_prefetch = 0 : i64, scratch_operands = 1 : i64, tpu.core_type = #tpu.core_type<tc>, window_params = [{transform_indices = @transform_0, window_bounds = array<i64: 8, 32>}, {transform_indices = @transform_1, window_bounds = array<i64: 32, 128>}, {transform_indices = @transform_2, window_bounds = array<i64: 1, 128>}, {transform_indices = @transform_3, window_bounds = array<i64: 8, 128>}]} {
    %c0_i32 = arith.constant 0 : i32
    %0 = arith.cmpi eq, %arg2, %c0_i32 : i32
    %1 = arith.extui %0 : i1 to i32
    %c0_i32_0 = arith.constant 0 : i32
    %2 = arith.cmpi ne, %1, %c0_i32_0 : i32
    scf.if %2 {
      %c0_10 = arith.constant 0 : index
      %c0_11 = arith.constant 0 : index
      %12 = vector.load %arg5[%c0_10, %c0_11] : memref<1x128xf32, #tpu.memory_space<vmem>>, vector<1x128xf32>
      %13 = vector.shape_cast %12 : vector<1x128xf32> to vector<1x128xf32>
      %14 = vector.broadcast %13 : vector<1x128xf32> to vector<8x128xf32>
      %c0_12 = arith.constant 0 : index
      %c0_13 = arith.constant 0 : index
      %15 = vector.load %arg7[%c0_12, %c0_13] : memref<8x128xf32, #tpu.memory_space<vmem>>, vector<8x128xf32>
      tpu.vector_store %arg7[%c0_12, %c0_13], %14 {strides = array<i32>} : memref<8x128xf32, #tpu.memory_space<vmem>>, vector<8x128xf32>,
    } else {
    }
    %c0 = arith.constant 0 : index
    %c0_1 = arith.constant 0 : index
    %3 = vector.load %arg7[%c0, %c0_1] : memref<8x128xf32, #tpu.memory_space<vmem>>, vector<8x128xf32>
    %c0_2 = arith.constant 0 : index
    %c0_3 = arith.constant 0 : index
    %4 = vector.load %arg3[%c0_2, %c0_3] : memref<8x32xf32, #tpu.memory_space<vmem>>, vector<8x32xf32>
    %c0_4 = arith.constant 0 : index
    %c0_5 = arith.constant 0 : index
    %5 = vector.load %arg4[%c0_4, %c0_5] : memref<32x128xf32, #tpu.memory_space<vmem>>, vector<32x128xf32>
    %cst = arith.constant dense<0.000000e+00> : vector<8x128xf32>
    %6 = tpu.matmul %4, %5, %cst {dimension_numbers = #tpu.dot_dimension_numbers<[1], [0], [0], [1], [0, 0, 1, 1], [], []>} : vector<8x32xf32>, vector<32x128xf32>, vector<8x128xf32> -> vector<8x128xf32>
    %7 = arith.addf %3, %6 : vector<8x128xf32>
    %c0_6 = arith.constant 0 : index
    %c0_7 = arith.constant 0 : index
    %8 = vector.load %arg7[%c0_6, %c0_7] : memref<8x128xf32, #tpu.memory_space<vmem>>, vector<8x128xf32>
    tpu.vector_store %arg7[%c0_6, %c0_7], %7 {strides = array<i32>} : memref<8x128xf32, #tpu.memory_space<vmem>>, vector<8x128xf32>,
    %c0_i32_8 = arith.constant 0 : i32
    %9 = arith.cmpi eq, %arg2, %c0_i32_8 : i32
    %10 = arith.extui %9 : i1 to i32
    %c0_i32_9 = arith.constant 0 : i32
    %11 = arith.cmpi ne, %10, %c0_i32_9 : i32
    scf.if %11 {
      %c0_10 = arith.constant 0 : index
      %c0_11 = arith.constant 0 : index
      %12 = vector.load %arg7[%c0_10, %c0_11] : memref<8x128xf32, #tpu.memory_space<vmem>>, vector<8x128xf32>
      %c0_12 = arith.constant 0 : index
      %c0_13 = arith.constant 0 : index
      %13 = vector.load %arg6[%c0_12, %c0_13] : memref<8x128xf32, #tpu.memory_space<vmem>>, vector<8x128xf32>
      tpu.vector_store %arg6[%c0_12, %c0_13], %12 {strides = array<i32>} : memref<8x128xf32, #tpu.memory_space<vmem>>, vector<8x128xf32>,
    } else {
    }
    return
  }
  func.func @transform_0(%arg0: i32, %arg1: i32, %arg2: i32) -> (i32, i32) {
    %c0_i32 = arith.constant 0 : i32
    return %arg0, %arg2 : i32, i32
  }
  func.func @transform_1(%arg0: i32, %arg1: i32, %arg2: i32) -> (i32, i32) {
    %c0_i32 = arith.constant 0 : i32
    return %arg2, %arg1 : i32, i32
  }
  func.func @transform_2(%arg0: i32, %arg1: i32, %arg2: i32) -> (i32, i32) {
    %c0_i32 = arith.constant 0 : i32
    %c0_i32_0 = arith.constant 0 : i32
    return %c0_i32, %arg1 : i32, i32
  }
  func.func @transform_3(%arg0: i32, %arg1: i32, %arg2: i32) -> (i32, i32) {
    %c0_i32 = arith.constant 0 : i32
    return %arg0, %arg1 : i32, i32
  }
}

</mosaic_0001>

<bundles_post_ra>
// kernel: _linear_apply.1
= control target key start
LH: loop header
LB: loop body
LE: loop exit
PB: predicated region body
PF: predicated region fallthrough
CT: control target
= control target key end

     0   :  { %8 = vsyncpa [#allocation4], 0  ;;  %s334_s0 = inlined_call_operand.hbm [shape: f32[8,32], index: 0, kind: input, shape index: {}]   ;;  %s335_s1 = inlined_call_operand.hbm [shape: f32[32,128], index: 1, kind: input, shape index: {}]   ;;  %s336_s2 = inlined_call_operand.vmem [shape: f32[1,128], index: 2, kind: input, shape index: {}]   ;;  %s337_s3 = inlined_call_operand.hbm [shape: f32[8,128], index: 3, kind: output, shape index: {}]  }
   0x1   :  { %9 = vsyncpa [#allocation7], 0 }
   0x2   :  { %10 = vsyncpa [#allocation5], 0  ;;  %s260_s12 = smov [#allocation3]   ;;  %s261_s14 = smov [#allocation6]  }
   0x3   :  { %s17_s13 = sshll.u32 %s260_s12, 4  ;;  %s26_s15 = sshll.u32 %s261_s14, 4  ;;  %s18_s13 = int_to_ptr.vmem [resolvable:$true] %s17_s13  ;;  %s288_s15 = int_to_ptr.vmem [resolvable:$true] %s26_s15 }
   0x4   :  { %s188_s18 = scalar_lea.hbm %s334_s0, 128 }
   0x5   :  { %p189_p0 = scmp.ne.s32.totalorder %s334_s0, %s188_s18  ;;  %p192_p1 = scmp.lt.u32.totalorder %s188_s18, %s334_s0 }
   0x7   :  { %p194_p2 = pnand %p192_p1, %p189_p0 }
   0x9   :  { %197 = shalt.err (!%p194_p2)
}
   0xa   :  { %s198_s23 = scalar_lea.vmem %s18_s13, 128  ;;  %p203_p4 = scmp.lt.s32.totalorder %s18_s13, %s18_s13 }
   0xb   :  { %p199_p3 = scmp.ne.s32.totalorder %s18_s13, %s198_s23  ;;  %p204_p5 = scmp.lt.s32.totalorder %s198_s23, %s198_s23 }
   0xd   :  { %p205_p6 = por %p204_p5, %p203_p4 }
   0xf   :  { %p206_p7 = pnand %p205_p6, %p199_p3 }
  0x11   :  { %209 = shalt.err (!%p206_p7)
}
  0x12   :  { %20 = dma.hbm_to_vmem [thread:$0]  %s334_s0, 128, %s18_s13, [#allocation4]  }
  0x13   :  { %s210_s28 = scalar_lea.hbm %s335_s1, 512 }
  0x14   :  { %p211_p8 = scmp.ne.s32.totalorder %s335_s1, %s210_s28  ;;  %p214_p9 = scmp.lt.u32.totalorder %s210_s28, %s335_s1 }
  0x16   :  { %p216_p10 = pnand %p214_p9, %p211_p8 }
  0x18   :  { %219 = shalt.err (!%p216_p10)
}
  0x19   :  { %s220_s6 = scalar_lea.vmem %s288_s15, 512  ;;  %p225_p12 = scmp.lt.s32.totalorder %s288_s15, %s288_s15 }
  0x1a   :  { %p221_p11 = scmp.ne.s32.totalorder %s288_s15, %s220_s6  ;;  %p226_p13 = scmp.lt.s32.totalorder %s220_s6, %s220_s6 }
  0x1c   :  { %p227_p0 = por %p226_p13, %p225_p12 }
  0x1e   :  { %p228_p1 = pnand %p227_p0, %p221_p11 }
  0x20   :  { %231 = shalt.err (!%p228_p1)
}
  0x21   :  { %s262_s0 = smov 128   ;;  %s263_s7 = smov 8  }
  0x22   :  { %32 = dma.hbm_to_vmem [thread:$0]  %s335_s1, 512, %s288_s15, [#allocation7], %s262_s0, %s262_s0, %s263_s7  }
  0x23   :  { %254 = dma.done.wait [#allocation4], 128  }
  0x24   :  { %255 = vsyncadd [#allocation4], 4294967168 }
  0x25   :  { %256 = dma.done.wait [#allocation7], 512  }
  0x26   :  { %257 = vsyncadd [#allocation7], 4294966784  ;;  %v264_v0 = vmov 0.0|0.0   ;;  %vm265_vm0 = vmmov 0   ;;  %v266_v1 = vmov 0.0   ;;  %v55_v2 = vld [vmem:[#allocation6] sm:$0xff] }
  0x27   :  { %174 = vmatprep.subr.bf16.mxu0 %v264_v0  ;;  %171 = vmatprep.mubr.msk.f32.mxu0 %vm265_vm0, %v266_v1  ;;  %v56_v3 = vld [vmem:[#allocation6 + $0x8] sm:$0xff]  ;;  %v57_v4 = vld [vmem:[#allocation6 + $0x10] sm:$0xff]  ;;  %v58_v6 = vld [vmem:[#allocation6 + $0x18] sm:$0xff]  ;;  %vm59_vm1 = vcmask 261120   ;;  %s267_s11 = smov [#allocation8]  }
  0x28   :  { %v175_v5 = vpack.c.bf16 %v56_v3, %v55_v2  ;;  %v178_v7 = vpack.c.bf16 %v58_v6, %v57_v4  ;;  %v54_v8 = vld [vmem:[#allocation3] sm:$0xff]  ;;  %s146_s12 = sshll.u32 %s267_s11, 4  ;;  %s147_s12 = int_to_ptr.vmem [resolvable:$true] %s146_s12 }
  0x29   :  { %v156_v9 = vld [vmem:[%s336_s2] ss:$0 sm:$0xff]  ;;  %s232_s13 = scalar_lea.vmem %s147_s12, 128  ;;  %p237_p3 = scmp.lt.s32.totalorder %s147_s12, %s147_s12 }
  0x2a   :  { %176 = vmatpush3.bf16.msra.mxu0 %v175_v5  ;;  %p233_p2 = scmp.ne.s32.totalorder %s147_s12, %s232_s13  ;;  %p238_p4 = scmp.lt.s32.totalorder %s232_s13, %s232_s13 }
  0x2b   :  { %177 = vmatprep.subr.bf16.mxu0 %v264_v0 }
  0x2c   :  { %p239_p5 = por %p238_p4, %p237_p3 }
  0x2e   :  { %179 = vmatpush3.bf16.msra.mxu0 %v178_v7  ;;  %p240_p6 = pnand %p239_p5, %p233_p2 }
  0x31   :  { %172 = vmatmul.mubr.msk.f32.vlgmr.msra.gmra.mrb[0].mxu0 %vm59_vm1, %v54_v8 }
 0x104   :  { %v129_v10 = vpop.f32.mrb[0].mxu0 }
 0x105   :  { %v133_v11 = vadd.f32 %v156_v9, %v129_v10  ;;  %v173_v12 = vpop.f32.mrb[1].mxu0 }
 0x107   :  { %139 = vst [vmem:[#allocation8] sm:$0xff] %v133_v11 }
 0x108   :  { %243 = shalt.err (!%p240_p6)
}
 0x109   :  { %s244_s16 = scalar_lea.hbm %s337_s3, 128 }
 0x10a   :  { %p245_p7 = scmp.ne.s32.totalorder %s337_s3, %s244_s16  ;;  %p248_p8 = scmp.lt.u32.totalorder %s244_s16, %s337_s3 }
 0x10c   :  { %p250_p9 = pnand %p248_p8, %p245_p7 }
 0x10e   :  { %253 = shalt.err (!%p250_p9)
}
 0x10f   :  { %149 = dma.vmem_to_hbm [thread:$0]  %s147_s12, 128, %s337_s3, [#allocation5]  }
 0x110   :  { %258 = dma.done.wait [#allocation5], 128  }
 0x111   :  { %259 = vsyncadd [#allocation5], 4294967168 }
 0x112   :  { %153 = vsyncpa [#allocation4], 1 }
 0x113   :  { %154 = vsyncpa [#allocation7], 1 }
 0x114   :  { %155 = vsyncpa [#allocation5], 1 }

</bundles_post_ra>
